<compile_context>
chip_gen: v6e
topology: v6e:2x2x1
jax: 0.10.0
libtpu: 0.0.40
codegen_flags: <defaults>
</compile_context>

<pallas_src>
import math
import functools

import jax
import jax.numpy as jnp
from jax import lax
from jax.experimental import pallas as pl
from jax.experimental.pallas import tpu as pltpu


_LANE = 128                     # last-dim (lane) granularity
_SUBLANE = 16                   # row granularity safe for bf16 (16) and f32 (8)
_VMEM_BUDGET = 24 * 1024 * 1024 # double-buffered working-set budget
_VMEM_LIMIT = 32 * 1024 * 1024  # explicit scoped-VMEM limit (safe on v5e/v6e/v7x)


def _round_up(x, m):
    return ((x + m - 1) // m) * m


def _linear_kernel(x_ref, w_ref, b_ref, o_ref):
    """One row-tile of y = x @ W^T + b.

    x_ref: (tm, D_pad)    bf16  activation row tile
    w_ref: (E_pad, D_pad) bf16  full weight, PyTorch (out, in) layout, resident
    b_ref: (1, E_pad)     f32   bias row
    o_ref: (tm, E_pad)          output row tile (lane-dense: E_pad % 128 == 0)
    """
    acc = lax.dot_general(
        x_ref[...], w_ref[...],
        dimension_numbers=(((1,), (1,)), ((), ())),  # contract D of x with D of W
        preferred_element_type=jnp.float32,          # f32 accumulate on the MXU
    )
    o_ref[...] = (acc + b_ref[...]).astype(o_ref.dtype)


def prepare_out_proj_params(weight, bias, compute_dtype=jnp.bfloat16):
    """One-time parameter prep (do once at load time, NOT per forward):
       keep the PyTorch (emb_dim, latent_dim) layout, zero-pad both dims to
       multiples of 128 (lane-dense tiles), cast weight to bf16, keep bias f32."""
    E, D = weight.shape
    E_pad, D_pad = _round_up(E, _LANE), _round_up(D, _LANE)
    w_pad = jnp.zeros((E_pad, D_pad), compute_dtype).at[:E, :D].set(
        weight.astype(compute_dtype))
    b_pad = jnp.zeros((1, E_pad), jnp.float32).at[0, :E].set(
        bias.astype(jnp.float32))
    return w_pad, b_pad, E


@functools.partial(jax.jit, static_argnames=("emb_dim", "compute_dtype", "tm_max"))
def codebook_embedding_forward(latents, w_pad, b_pad, *, emb_dim,
                               compute_dtype=jnp.bfloat16, tm_max=512):
    """latents: [B, T, D] -> [B, T, emb_dim] using padded params from
    prepare_out_proj_params."""
    B, T, D = latents.shape
    E_pad, D_pad = w_pad.shape
    M = B * T

    # ---- choose the row tile --------------------------------------------------
    # <= tm_max rows, multiple of 16 (bf16 sublane packing), and aim for >= 2 grid
    # steps so v7x's second TensorCore gets work and the pipeline overlaps
    # prefetch/compute/writeback.
    tm = min(tm_max, max(_SUBLANE, _round_up(pl.cdiv(M, 2), _SUBLANE)))

    in_bytes = jnp.dtype(compute_dtype).itemsize
    out_bytes = jnp.dtype(latents.dtype).itemsize

    def working_set(tm_):
        return (2 * E_pad * D_pad * in_bytes      # resident weight (double-buffered)
                + 2 * tm_ * D_pad * in_bytes      # activation tile
                + 2 * tm_ * E_pad * out_bytes     # output tile
                + 2 * E_pad * 4)                  # bias

    while tm > _SUBLANE and working_set(tm) > _VMEM_BUDGET:
        tm = _round_up(tm // 2, _SUBLANE)
    if working_set(tm) > _VMEM_BUDGET:
        # TODO(synk): add E (tn) and K (tk) grid axes with an f32 acc scratch and
        # pl.when init/finalize for weights too large to keep resident in VMEM.
        raise NotImplementedError("out_proj weight too large for resident-weight kernel")

    M_pad = _round_up(M, tm)

    # ---- layout plumbing: lane/sublane-dense, bf16 activations -----------------
    x2d = latents.reshape(M, D).astype(compute_dtype)
    if (M_pad, D_pad) != (M, D):
        x2d = jnp.zeros((M_pad, D_pad), compute_dtype).at[:M, :D].set(x2d)

    out2d = pl.pallas_call(
        _linear_kernel,
        out_shape=jax.ShapeDtypeStruct((M_pad, E_pad), latents.dtype),
        grid_spec=pl.GridSpec(
            grid=(M_pad // tm,),
            in_specs=[
                pl.BlockSpec((tm, D_pad), lambda i: (i, 0)),     # activation row tile
                pl.BlockSpec((E_pad, D_pad), lambda i: (0, 0)),  # full weight, resident
                pl.BlockSpec((1, E_pad), lambda i: (0, 0)),      # bias row
            ],
            out_specs=pl.BlockSpec((tm, E_pad), lambda i: (i, 0)),
        ),
        compiler_params=pltpu.CompilerParams(
            dimension_semantics=("parallel",),      # megacore-shard row tiles (v7x)
            vmem_limit_bytes=_VMEM_LIMIT,           # explicit, generation-safe
        ),
    )(x2d, w_pad, b_pad)

    return out2d[:M, :emb_dim].reshape(B, T, emb_dim)


def init_codebook_embedding_params(key, vocab_size, latent_dim, n_codebooks, emb_dim,
                                   special_tokens=("MASK",)):
    """Deterministic synthetic init mirroring the PyTorch module's parameter shapes."""
    k_w, k_b, k_s = jax.random.split(key, 3)
    # nn.Linear default: kaiming-uniform weight, uniform bias, bound 1/sqrt(fan_in)
    bound_w = 1.0 / math.sqrt(latent_dim)
    weight = jax.random.uniform(k_w, (emb_dim, latent_dim), jnp.float32,
                                minval=-bound_w, maxval=bound_w)
    bias = jax.random.uniform(k_b, (emb_dim,), jnp.float32,
                              minval=-bound_w, maxval=bound_w)
    # special-token embeddings exist in __init__ but are unused by forward()
    special = {tkn: jax.random.normal(jax.random.fold_in(k_s, i),
                                      (n_codebooks, latent_dim), jnp.float32)
               for i, tkn in enumerate(special_tokens)}
    return {"out_proj_weight": weight, "out_proj_bias": bias, "special": special}


if __name__ == "__main__":
    vocab_size, latent_dim, n_codebooks, emb_dim = 1024, 32, 4, 32
    B, T = 2, 8

    key = jax.random.PRNGKey(0)
    k_params, k_x1, k_x2 = jax.random.split(key, 3)
    params = init_codebook_embedding_params(k_params, vocab_size, latent_dim,
                                            n_codebooks, emb_dim)

    # one-time param prep (pre-padded, bf16 weight, f32 bias) — not in the hot path
    w_pad, b_pad, _ = prepare_out_proj_params(params["out_proj_weight"],
                                              params["out_proj_bias"])

    def check(latents):
        out = codebook_embedding_forward(latents, w_pad, b_pad, emb_dim=emb_dim)
        out = jax.block_until_ready(out)
        Bc, Tc, _ = latents.shape
        assert out.shape == (Bc, Tc, emb_dim)
        # reference with the same bf16 operand quantization + f32 accumulation
        xq = latents.astype(jnp.bfloat16).astype(jnp.float32)
        wq = params["out_proj_weight"].astype(jnp.bfloat16).astype(jnp.float32)
        ref = xq @ wq.T + params["out_proj_bias"]
        assert jnp.allclose(out, ref, atol=1e-4, rtol=1e-4), \
            float(jnp.max(jnp.abs(out - ref)))

    # small shape from the module's forward() contract: latents [B, T, latent_dim]
    check(jax.random.normal(k_x1, (B, T, latent_dim), jnp.float32))
    # ragged / larger shape: exercises padding on every dim and a >=2-step grid
    check(jax.random.normal(k_x2, (3, 100, latent_dim), jnp.float32))

    print("KERNEL_OK")
</pallas_src>

<mosaic_0001>
module attributes {stable_mosaic.version = 11 : i64} {
  func.func @_linear_kernel(%arg0: i32, %arg1: memref<16x128xbf16, #tpu.memory_space<vmem>>, %arg2: memref<128x128xbf16, #tpu.memory_space<vmem>>, %arg3: memref<1x128xf32, #tpu.memory_space<vmem>>, %arg4: memref<16x128xf32, #tpu.memory_space<vmem>>) attributes {dimension_semantics = [#tpu.dimension_semantics<parallel>], iteration_bounds = array<i64: 1>, scalar_prefetch = 0 : i64, scratch_operands = 0 : i64, tpu.core_type = #tpu.core_type<tc>, window_params = [{transform_indices = @transform_0, window_bounds = array<i64: 16, 128>}, {pipeline_mode = #tpu.pipeline_mode<synchronous>, transform_indices = @transform_1, window_bounds = array<i64: 128, 128>}, {pipeline_mode = #tpu.pipeline_mode<synchronous>, transform_indices = @transform_2, window_bounds = array<i64: 1, 128>}, {transform_indices = @transform_3, window_bounds = array<i64: 16, 128>}]} {
    %c0 = arith.constant 0 : index
    %c0_0 = arith.constant 0 : index
    %0 = vector.load %arg1[%c0, %c0_0] : memref<16x128xbf16, #tpu.memory_space<vmem>>, vector<16x128xbf16>
    %c0_1 = arith.constant 0 : index
    %c0_2 = arith.constant 0 : index
    %1 = vector.load %arg2[%c0_1, %c0_2] : memref<128x128xbf16, #tpu.memory_space<vmem>>, vector<128x128xbf16>
    %cst = arith.constant dense<0.000000e+00> : vector<16x128xf32>
    %2 = tpu.matmul %0, %1, %cst {dimension_numbers = #tpu.dot_dimension_numbers<[1], [1], [0], [0], [0, 0, 1, 0], [], []>} : vector<16x128xbf16>, vector<128x128xbf16>, vector<16x128xf32> -> vector<16x128xf32>
    %c0_3 = arith.constant 0 : index
    %c0_4 = arith.constant 0 : index
    %3 = vector.load %arg3[%c0_3, %c0_4] : memref<1x128xf32, #tpu.memory_space<vmem>>, vector<1x128xf32>
    %4 = vector.broadcast %3 : vector<1x128xf32> to vector<16x128xf32>
    %5 = arith.addf %2, %4 : vector<16x128xf32>
    %c0_5 = arith.constant 0 : index
    %c0_6 = arith.constant 0 : index
    %6 = vector.load %arg4[%c0_5, %c0_6] : memref<16x128xf32, #tpu.memory_space<vmem>>, vector<16x128xf32>
    tpu.vector_store %arg4[%c0_5, %c0_6], %5 {strides = array<i32>} : memref<16x128xf32, #tpu.memory_space<vmem>>, vector<16x128xf32>,
    return
  }
  func.func @transform_0(%arg0: i32) -> (i32, i32) {
    %c0_i32 = arith.constant 0 : i32
    %c0_i32_0 = arith.constant 0 : i32
    return %arg0, %c0_i32 : i32, i32
  }
  func.func @transform_1(%arg0: i32) -> (i32, i32) {
    %c0_i32 = arith.constant 0 : i32
    %c0_i32_0 = arith.constant 0 : i32
    %c0_i32_1 = arith.constant 0 : i32
    return %c0_i32, %c0_i32_0 : i32, i32
  }
  func.func @transform_2(%arg0: i32) -> (i32, i32) {
    %c0_i32 = arith.constant 0 : i32
    %c0_i32_0 = arith.constant 0 : i32
    %c0_i32_1 = arith.constant 0 : i32
    return %c0_i32, %c0_i32_0 : i32, i32
  }
  func.func @transform_3(%arg0: i32) -> (i32, i32) {
    %c0_i32 = arith.constant 0 : i32
    %c0_i32_0 = arith.constant 0 : i32
    return %arg0, %c0_i32 : i32, i32
  }
}

</mosaic_0001>

<bundles_post_ra>
// kernel: codebook_embedding_forward.1
= control target key start
LH: loop header
LB: loop body
LE: loop exit
PB: predicated region body
PF: predicated region fallthrough
CT: control target
= control target key end

     0   :  { %8 = vsyncpa [#allocation3], 0  ;;  %s231_s12 = smov [#allocation2]   ;;  %s271_s0 = inlined_call_operand.vmem [shape: bf16[16,128], index: 0, kind: input, shape index: {}]   ;;  %s272_s1 = inlined_call_operand.hbm [shape: bf16[128,128], index: 1, kind: input, shape index: {}]   ;;  %s273_s2 = inlined_call_operand.vmem [shape: f32[1,128], index: 2, kind: input, shape index: {}]   ;;  %s274_s3 = inlined_call_operand.vmem [shape: f32[16,128], index: 3, kind: output, shape index: {}]  }
   0x1   :  { %s16_s13 = sshll.u32 %s231_s12, 4  ;;  %s17_s13 = int_to_ptr.vmem [resolvable:$true] %s16_s13 }
   0x2   :  { %s217_s14 = scalar_lea.vmem %s17_s13, 1024  ;;  %p222_p1 = scmp.lt.s32.totalorder %s17_s13, %s17_s13 }
   0x3   :  { %p218_p0 = scmp.ne.s32.totalorder %s17_s13, %s217_s14  ;;  %p223_p2 = scmp.lt.s32.totalorder %s217_s14, %s217_s14 }
   0x5   :  { %p224_p3 = por %p223_p2, %p222_p1 }
   0x7   :  { %p225_p4 = pnand %p224_p3, %p218_p0 }
   0x9   :  { %228 = shalt.err (!%p225_p4)
}
   0xa   :  { %s232_s15 = smov 64   ;;  %s233_s16 = smov 4  }
   0xb   :  { %22 = dma.hbm_to_vmem [thread:$0]  %s272_s1, 1024, %s17_s13, [#allocation3], %s232_s15, %s232_s15, %s233_s16  }
   0xc   :  { %229 = dma.done.wait [#allocation3], 1024  }
   0xd   :  { %230 = vsyncadd [#allocation3], 4294966272  ;;  %v234_v0 = vmov 0.0   ;;  %vm235_vm0 = vmmov 0   ;;  %v200_v1 = vld [vmem:[#allocation2 + $0x38] sm:$0xff]   ;;  %v201_v2 = vld [vmem:[#allocation2 + $0x30] sm:$0xff]  }
   0xe   :  { %175 = vmatprep.subr.bf16.mxu0 %v234_v0  ;;  %191 = vmatprep.mubr.msk.bf16.mxu0 %vm235_vm0, %v234_v0  ;;  %v202_v3 = vld [vmem:[#allocation2 + $0x28] sm:$0xff]   ;;  %v203_v4 = vld [vmem:[#allocation2 + $0x20] sm:$0xff]   ;;  %v204_v5 = vld [vmem:[#allocation2 + $0x18] sm:$0xff]  }
   0xf   :  { %176 = vmatpush3.bf16.xpose.msra.mxu0 %v200_v1  ;;  %v205_v6 = vld [vmem:[#allocation2 + $0x10] sm:$0xff]   ;;  %v206_v7 = vld [vmem:[#allocation2 + $0x8] sm:$0xff]   ;;  %v207_v8 = vld [vmem:[#allocation2] sm:$0xff]  }
  0x10   :  { %177 = vmatprep.subr.bf16.mxu0 %v234_v0  ;;  %v208_v9 = vld [vmem:[%s271_s0] sm:$0xff]  }
  0x11   :  { %v156_v10 = vld [vmem:[%s273_s2] ss:$0 sm:$0xff] }
  0x17   :  { %178 = vmatpush3.bf16.xpose.msra.mxu0 %v201_v2 }
  0x18   :  { %179 = vmatprep.subr.bf16.mxu0 %v234_v0 }
  0x1f   :  { %180 = vmatpush3.bf16.xpose.msra.mxu0 %v202_v3 }
  0x20   :  { %181 = vmatprep.subr.bf16.mxu0 %v234_v0 }
  0x27   :  { %182 = vmatpush3.bf16.xpose.msra.mxu0 %v203_v4 }
  0x28   :  { %183 = vmatprep.subr.bf16.mxu0 %v234_v0 }
  0x2f   :  { %184 = vmatpush3.bf16.xpose.msra.mxu0 %v204_v5 }
  0x30   :  { %185 = vmatprep.subr.bf16.mxu0 %v234_v0 }
  0x37   :  { %186 = vmatpush3.bf16.xpose.msra.mxu0 %v205_v6 }
  0x38   :  { %187 = vmatprep.subr.bf16.mxu0 %v234_v0 }
  0x3f   :  { %188 = vmatpush3.bf16.xpose.msra.mxu0 %v206_v7 }
  0x40   :  { %189 = vmatprep.subr.bf16.mxu0 %v234_v0 }
  0x47   :  { %190 = vmatpush3.bf16.xpose.msra.mxu0 %v207_v8 }
  0x4e   :  { %192 = vmatmul.mubr.bf16.vlgmr.msra.gmra.mxu0 %v208_v9 }
 0x10e   :  { %v142_v11 = vpop.f32.mrf.mxu0 }
 0x10f   :  { %v143_v12 = vadd.f32 %v156_v10, %v142_v11 }
 0x110   :  { %v193_v13 = vpop.f32.mrf.mxu0 }
 0x111   :  { %149 = vst [vmem:[%s274_s3] sm:$0xff] %v143_v12 }
 0x112   :  { %v145_v14 = vpop.f32.mrf.mxu0 }
 0x113   :  { %v146_v15 = vadd.f32 %v156_v10, %v145_v14 }
 0x114   :  { %v194_v16 = vpop.f32.mrf.mxu0 }
 0x115   :  { %150 = vst [vmem:[%s274_s3 + $0x8] sm:$0xff] %v146_v15 }
 0x116   :  { %155 = vsyncpa [#allocation3], 1 }

</bundles_post_ra>
